<compile_context>
chip_gen: v7x
topology: tpu7x:2x2x1
jax: 0.10.0
libtpu: 0.0.40
codegen_flags: <defaults>
</compile_context>

<pallas_src>
import functools

import jax
import jax.numpy as jnp
import numpy as np
from jax.experimental import pallas as pl
from jax.experimental.pallas import tpu as pltpu


# ---------------------------------------------------------------------------
# Kernels.  Block layout: (B_blk, C, T), channel reduction along axis=1.
# weight/bias refs are (C, 1) and broadcast against (B_blk, C, T).
# ---------------------------------------------------------------------------
def _ln_withbias_kernel(x_ref, w_ref, b_ref, o_ref, *, eps):
    x = x_ref[...].astype(jnp.float32)                 # (B_blk, C, T)
    mu = jnp.mean(x, axis=1, keepdims=True)            # (B_blk, 1, T)
    xc = x - mu
    var = jnp.mean(xc * xc, axis=1, keepdims=True)     # biased variance
    inv = jax.lax.rsqrt(var + eps)                     # EUP slot
    w = w_ref[...].astype(jnp.float32)                 # (C, 1)
    b = b_ref[...].astype(jnp.float32)
    o_ref[...] = (xc * inv * w + b).astype(o_ref.dtype)


def _ln_biasfree_kernel(x_ref, w_ref, o_ref, *, eps):
    x = x_ref[...].astype(jnp.float32)
    mu = jnp.mean(x, axis=1, keepdims=True)
    xc = x - mu
    var = jnp.mean(xc * xc, axis=1, keepdims=True)
    inv = jax.lax.rsqrt(var + eps)
    w = w_ref[...].astype(jnp.float32)
    o_ref[...] = (x * inv * w).astype(o_ref.dtype)     # BiasFree keeps the mean in x


# ---------------------------------------------------------------------------
# Block / grid selection (VMEM-budget driven, generation-agnostic).
# ---------------------------------------------------------------------------
_TARGET_BLOCK_BYTES = 2 * 1024 * 1024   # ~2 MiB per block (near-roofline per
                                        # measured 512/1024-lane data); x4 resident
                                        # (in+out, double-buffered) fits all gens.


def _choose_blocks(B, C, HW, itemsize):
    row_bytes = C * itemsize                                   # one spatial column
    max_tile = max(128, (_TARGET_BLOCK_BYTES // row_bytes) // 128 * 128)
    if HW > max_tile:
        # Large images: one image per step, fixed lane-multiple tile, cdiv grid.
        # Partial last tile is safe: the reduction is along C, OOB stores masked.
        b_blk, tile_hw = 1, max_tile
    else:
        # Small/medium images: full spatial extent (always a legal block) and
        # several batch images per step, up to the byte budget.
        tile_hw = HW
        img_bytes = max(HW * row_bytes, 1)
        b_blk = max(1, min(B, _TARGET_BLOCK_BYTES // img_bytes))
        while B % b_blk:                                       # keep batch blocks full
            b_blk -= 1
    grid_b = pl.cdiv(B, b_blk)
    grid_t = pl.cdiv(HW, tile_hw)
    # v7x megacore: keep >= 2 parallel grid steps whenever there is enough work
    # (no-op on single-TC v5e/v6e).
    if grid_b * grid_t < 2:
        if b_blk > 1:
            b_blk //= 2
            while B % b_blk:
                b_blk -= 1
            grid_b = pl.cdiv(B, b_blk)
        elif HW > 128:
            tile_hw = max(128, (pl.cdiv(HW, 2) + 127) // 128 * 128)
            grid_t = pl.cdiv(HW, tile_hw)
    return b_blk, tile_hw, (grid_b, grid_t)


# ---------------------------------------------------------------------------
# Wrapper (matches LayerNorm in Ufuser.py).
# ---------------------------------------------------------------------------
def layernorm_pallas(x_nchw, weight, bias=None, *, layer_norm_type="WithBias",
                     eps=1e-5):
    """Channel LayerNorm of an NCHW tensor.

    x_nchw: (B, C, H, W);  weight: (C,);  bias: (C,) or None (BiasFree).
    """
    B, C, H, W = x_nchw.shape
    HW = H * W
    bias_free = (layer_norm_type == "BiasFree")

    x = x_nchw.reshape(B, C, HW)                      # contiguous view, no relayout
    w2 = weight.reshape(C, 1)

    b_blk, tile_hw, grid = _choose_blocks(B, C, HW,
                                          jnp.dtype(x_nchw.dtype).itemsize)

    x_spec = pl.BlockSpec((b_blk, C, tile_hw), lambda b, t: (b, 0, t))
    p_spec = pl.BlockSpec((C, 1), lambda b, t: (0, 0))

    if bias_free:
        kernel = functools.partial(_ln_biasfree_kernel, eps=eps)
        in_specs = [x_spec, p_spec]
        args = (x, w2)
    else:
        if bias is None:
            bias = jnp.zeros((C,), x_nchw.dtype)
        kernel = functools.partial(_ln_withbias_kernel, eps=eps)
        in_specs = [x_spec, p_spec, p_spec]
        args = (x, w2, bias.reshape(C, 1))

    out = pl.pallas_call(
        kernel,
        out_shape=jax.ShapeDtypeStruct((B, C, HW), x_nchw.dtype),
        grid=grid,
        in_specs=in_specs,
        out_specs=x_spec,
        compiler_params=pltpu.CompilerParams(
            dimension_semantics=("parallel", "parallel"),
            vmem_limit_bytes=32 * 1024 * 1024),
    )(*args)
    return out.reshape(B, C, H, W)


# ---------------- pure-JAX reference (mirrors the PyTorch module) ----------------
def _layernorm_ref(x_nchw, weight, bias, *, layer_norm_type, eps=1e-5):
    B, C, H, W = x_nchw.shape
    xt = jnp.transpose(x_nchw, (0, 2, 3, 1)).reshape(B, H * W, C)    # to_3d
    mu = jnp.mean(xt, axis=-1, keepdims=True)
    var = jnp.mean((xt - mu) ** 2, axis=-1, keepdims=True)           # unbiased=False
    if layer_norm_type == "BiasFree":
        y = xt / jnp.sqrt(var + eps) * weight
    else:
        y = (xt - mu) / jnp.sqrt(var + eps) * weight + bias
    return jnp.transpose(y.reshape(B, H, W, C), (0, 3, 1, 2))        # to_4d


if __name__ == "__main__":
    key = jax.random.PRNGKey(0)

    # Case 1: typical small Ufuser shape (dim=32 channels, 16x16 spatial, batch 2).
    B, C, H, W = 2, 32, 16, 16
    kx, kw, kb, k2 = jax.random.split(key, 4)
    x = jax.random.normal(kx, (B, C, H, W), jnp.float32)
    weight = 1.0 + 0.1 * jax.random.normal(kw, (C,), jnp.float32)
    bias = 0.1 * jax.random.normal(kb, (C,), jnp.float32)

    for lnt, b in (("WithBias", bias), ("BiasFree", None)):
        out = jax.block_until_ready(layernorm_pallas(x, weight, b,
                                                     layer_norm_type=lnt))
        ref = _layernorm_ref(
            x, weight, jnp.zeros_like(weight) if b is None else b,
            layer_norm_type=lnt)
        np.testing.assert_allclose(np.asarray(out), np.asarray(ref),
                                   rtol=1e-4, atol=1e-5)

    # Case 2: odd spatial size (H*W not a multiple of 128) exercises the
    # cdiv/partial-lane-tile path and the B==1 megacore split.
    B2, C2, H2, W2 = 1, 16, 13, 11
    kx2, kw2, kb2 = jax.random.split(k2, 3)
    x2 = jax.random.normal(kx2, (B2, C2, H2, W2), jnp.float32)
    w2_ = 1.0 + 0.1 * jax.random.normal(kw2, (C2,), jnp.float32)
    b2_ = 0.1 * jax.random.normal(kb2, (C2,), jnp.float32)
    out2 = jax.block_until_ready(layernorm_pallas(x2, w2_, b2_,
                                                  layer_norm_type="WithBias"))
    ref2 = _layernorm_ref(x2, w2_, b2_, layer_norm_type="WithBias")
    np.testing.assert_allclose(np.asarray(out2), np.asarray(ref2),
                               rtol=1e-4, atol=1e-5)

    print("KERNEL_OK")
</pallas_src>

<mosaic_0001>
module attributes {stable_mosaic.version = 11 : i64} {
  func.func @_ln_withbias_kernel(%arg0: i32, %arg1: i32, %arg2: memref<1x32x256xf32, #tpu.memory_space<vmem>>, %arg3: memref<32x1xf32, #tpu.memory_space<vmem>>, %arg4: memref<32x1xf32, #tpu.memory_space<vmem>>, %arg5: memref<1x32x256xf32, #tpu.memory_space<vmem>>) attributes {dimension_semantics = [#tpu.dimension_semantics<parallel>, #tpu.dimension_semantics<parallel>], iteration_bounds = array<i64: 2, 1>, scalar_prefetch = 0 : i64, scratch_operands = 0 : i64, tpu.core_type = #tpu.core_type<tc>, window_params = [{transform_indices = @transform_0, window_bounds = array<i64: 1, 32, 256>}, {pipeline_mode = #tpu.pipeline_mode<synchronous>, transform_indices = @transform_1, window_bounds = array<i64: 32, 1>}, {pipeline_mode = #tpu.pipeline_mode<synchronous>, transform_indices = @transform_2, window_bounds = array<i64: 32, 1>}, {transform_indices = @transform_3, window_bounds = array<i64: 1, 32, 256>}]} {
    %c0 = arith.constant 0 : index
    %c0_0 = arith.constant 0 : index
    %c0_1 = arith.constant 0 : index
    %0 = vector.load %arg2[%c0, %c0_0, %c0_1] : memref<1x32x256xf32, #tpu.memory_space<vmem>>, vector<1x32x256xf32>
    %cst = arith.constant dense<0.000000e+00> : vector<1x256xf32>
    %1 = vector.multi_reduction <add>, %0, %cst [1] : vector<1x32x256xf32> to vector<1x256xf32>
    %2 = vector.shape_cast %1 : vector<1x256xf32> to vector<1x1x256xf32>
    %cst_2 = arith.constant 3.200000e+01 : f32
    %3 = vector.broadcast %cst_2 : f32 to vector<1x1x256xf32>
    %4 = arith.divf %2, %3 : vector<1x1x256xf32>
    %5 = vector.broadcast %4 : vector<1x1x256xf32> to vector<1x32x256xf32>
    %6 = arith.subf %0, %5 : vector<1x32x256xf32>
    %7 = arith.mulf %6, %6 : vector<1x32x256xf32>
    %cst_3 = arith.constant dense<0.000000e+00> : vector<1x256xf32>
    %8 = vector.multi_reduction <add>, %7, %cst_3 [1] : vector<1x32x256xf32> to vector<1x256xf32>
    %9 = vector.shape_cast %8 : vector<1x256xf32> to vector<1x1x256xf32>
    %cst_4 = arith.constant 3.200000e+01 : f32
    %10 = vector.broadcast %cst_4 : f32 to vector<1x1x256xf32>
    %11 = arith.divf %9, %10 : vector<1x1x256xf32>
    %cst_5 = arith.constant 9.99999974E-6 : f32
    %12 = vector.broadcast %cst_5 : f32 to vector<1x1x256xf32>
    %13 = arith.addf %11, %12 : vector<1x1x256xf32>
    %14 = math.rsqrt %13 : vector<1x1x256xf32>
    %c0_6 = arith.constant 0 : index
    %c0_7 = arith.constant 0 : index
    %15 = vector.load %arg3[%c0_6, %c0_7] : memref<32x1xf32, #tpu.memory_space<vmem>>, vector<32x1xf32>
    %c0_8 = arith.constant 0 : index
    %c0_9 = arith.constant 0 : index
    %16 = vector.load %arg4[%c0_8, %c0_9] : memref<32x1xf32, #tpu.memory_space<vmem>>, vector<32x1xf32>
    %17 = vector.broadcast %14 : vector<1x1x256xf32> to vector<1x32x256xf32>
    %18 = arith.mulf %6, %17 : vector<1x32x256xf32>
    %19 = vector.shape_cast %15 : vector<32x1xf32> to vector<1x32x1xf32>
    %20 = vector.broadcast %19 : vector<1x32x1xf32> to vector<1x32x256xf32>
    %21 = arith.mulf %18, %20 : vector<1x32x256xf32>
    %22 = vector.shape_cast %16 : vector<32x1xf32> to vector<1x32x1xf32>
    %23 = vector.broadcast %22 : vector<1x32x1xf32> to vector<1x32x256xf32>
    %24 = arith.addf %21, %23 : vector<1x32x256xf32>
    %c0_10 = arith.constant 0 : index
    %c0_11 = arith.constant 0 : index
    %c0_12 = arith.constant 0 : index
    %25 = vector.load %arg5[%c0_10, %c0_11, %c0_12] : memref<1x32x256xf32, #tpu.memory_space<vmem>>, vector<1x32x256xf32>
    tpu.vector_store %arg5[%c0_10, %c0_11, %c0_12], %24 {strides = array<i32>} : memref<1x32x256xf32, #tpu.memory_space<vmem>>, vector<1x32x256xf32>,
    return
  }
  func.func @transform_0(%arg0: i32, %arg1: i32) -> (i32, i32, i32) {
    %c0_i32 = arith.constant 0 : i32
    %c0_i32_0 = arith.constant 0 : i32
    return %arg0, %c0_i32, %arg1 : i32, i32, i32
  }
  func.func @transform_1(%arg0: i32, %arg1: i32) -> (i32, i32) {
    %c0_i32 = arith.constant 0 : i32
    %c0_i32_0 = arith.constant 0 : i32
    %c0_i32_1 = arith.constant 0 : i32
    return %c0_i32, %c0_i32_0 : i32, i32
  }
  func.func @transform_2(%arg0: i32, %arg1: i32) -> (i32, i32) {
    %c0_i32 = arith.constant 0 : i32
    %c0_i32_0 = arith.constant 0 : i32
    %c0_i32_1 = arith.constant 0 : i32
    return %c0_i32, %c0_i32_0 : i32, i32
  }
  func.func @transform_3(%arg0: i32, %arg1: i32) -> (i32, i32, i32) {
    %c0_i32 = arith.constant 0 : i32
    %c0_i32_0 = arith.constant 0 : i32
    return %arg0, %c0_i32, %arg1 : i32, i32, i32
  }
}

</mosaic_0001>

<bundles_post_ra>
// kernel: tpu_custom_call.1
= control target key start
LH: loop header
LB: loop body
LE: loop exit
PB: predicated region body
PF: predicated region fallthrough
CT: control target
= control target key end

     0   :  { %8 = vsyncpa [#allocation3], 0  ;;  %s905_s0 = inlined_call_operand.hbm [shape: f32[2,32,256], index: 0, kind: input, shape index: {}]   ;;  %s906_s1 = inlined_call_operand.vmem [shape: f32[32,1], index: 1, kind: input, shape index: {}]   ;;  %s907_s2 = inlined_call_operand.vmem [shape: f32[32,1], index: 2, kind: input, shape index: {}]   ;;  %s908_s3 = inlined_call_operand.hbm [shape: f32[2,32,256], index: 3, kind: output, shape index: {}]  }
   0x1   :  { %10 = vsyncpa [#allocation3 + $0x1], 0 }
   0x2   :  { %11 = vsyncpa [#allocation4], 0 }
   0x3   :  { %13 = vsyncpa [#allocation4 + $0x1], 0  ;;  %s692_s12 = smov 0   ;;  %s694_s13 = smov 0  }
   0x4   :  { %s696_s14 = smov 0   ;;  %s698_s15 = smov 0  }
   0x5   :  { %s700_s16 = smov 0   ;;  %s702_s17 = smov 0  }
   0x6 LB: > { %s461_s18 = sadd.s32 4294967295, %s663_s17   ;;  %s462_s19 = sadd.s32 4294967294, %s663_s17   ;;  %s663_s17 = sphi %s702_s17, %s19_s17   ;;  %s659_s16 = sphi %s700_s16, %s923_s16   ;;  %s655_s15 = sphi %s698_s15, %s922_s15   ;;  %s651_s14 = sphi %s696_s14, %s921_s14   ;;  %s647_s13 = sphi %s694_s13, %s920_s13   ;;  %s643_s12 = sphi %s692_s12, %s919_s12  }
   0x7   : > { %s31_s20 = sadd.s32 1, %s659_s16  ;;  %s40_s21 = sadd.s32 1, %s651_s14 }
   0x8   : > { %p33_p0 = scmp.ge.s32.totalorder %s31_s20, 2  ;;  %p47_p1 = scmp.ne.s32.totalorder %s651_s14, %s647_s13 }
   0x9   : > { %p48_p2 = scmp.eq.s32.totalorder %s663_s17, 0  ;;  %p53_p3 = scmp.ne.s32.totalorder %s647_s13, %s643_s12 }
   0xa   : > { %s925_s20 = smov (%p33_p0, %s31_s20), 0  ;;  %p54_p5 = scmp.eq.s32.totalorder %s461_s18, 0 }
   0xb   : > { %p733_p4 = por %p48_p2, %p47_p1  ;;  %s35_s23 = ssub.s32 %s659_s16, %s925_s20 }
   0xc   : > { %p121_p6 = scmp.eq.s32.totalorder %s461_s18, 1  ;;  %p38_p7 = scmp.eq.s32.totalorder %s35_s23, 0 }
   0xd   : > { %p739_p8 = por %p54_p5, %p53_p3  ;;  %p127_p10 = scmp.eq.s32.totalorder %s462_s19, 1 }
   0xe   : > { %p743_p9 = por %p121_p6, %p47_p1  ;;  %p490_p13 = scmp.lt.s32.totalorder %s663_s17, 2 }
   0xf   : > { %s748_s26 = scalar_select %p38_p7, %s651_s14, %s40_s21  }
  0x10   : > { %s912_s25 = scalar_select %p743_p9, 1, 0 }
  0x11   : > { %p750_p11 = por %p127_p10, %p53_p3  ;;  %s153_s28 = sand.u32 1, %s651_s14  }
  0x12   : > { %s465_s29 = sshll.u32 %s153_s28, 6  ;;  %s476_s30 = sshll.u32 %s659_s16, 10 }
  0x13   : > { %s913_s27 = scalar_select %p750_p11, 1, 0 }
  0x14   : > { %s761_s6 = scalar_lea.hbm %s905_s0, %s476_s30  ;;  %s157_s7 = scalar_lea.vmem [#allocation2], %s465_s29 }
  0x15   : > { %s166_s8 = sshll.u32 %s157_s7, 4  ;;  %p767_p0 = pnand %p490_p13, %p733_p4  ;;  %s763_s8 = int_to_ptr.vmem [resolvable:$true] %s166_s8 }
  0x16   : > { %s772_s10 = scalar_lea.sflag [#allocation3], %s153_s28  ;;  %s551_s11 = scalar_lea.hbm %s761_s6, 1024 }
  0x17   : > { %p552_p2 = scmp.ne.s32.totalorder %s761_s6, %s551_s11  ;;  %p553_p3 = pneg %p767_p0 }
  0x18   : > { %s556_s21 = scalar_lea.hbm %s905_s0, 2048  ;;  %p557_p4 = scmp.lt.u32.totalorder %s761_s6, %s905_s0 }
  0x19   : > { %p554_p5 = pnand %p553_p3, %p552_p2  ;;  %p558_p7 = scmp.lt.u32.totalorder %s556_s21, %s551_s11 }
  0x1a   : > { %p560_p13 = scmp.lt.u32.totalorder %s551_s11, %s761_s6 }
  0x1b   : > { %p555_p6 = pneg %p554_p5  ;;  %p559_p10 = por %p558_p7, %p557_p4 }
  0x1d   : > { %p561_p12 = por %p560_p13, %p559_p10 }
  0x1f   : > { %p562_p1 = pnand %p561_p12, %p555_p6 }
  0x21   : > { %565 = shalt.err (!%p562_p1)
}
  0x22   : > { %s566_s28 = scalar_lea.vmem %s763_s8, 1024  ;;  %s665_s29 = smov [#allocation2]  }
  0x23   : > { %p567_p2 = scmp.ne.s32.totalorder %s763_s8, %s566_s28  ;;  %s571_s30 = sshll.u32 %s665_s29, 4  ;;  %s572_s30 = int_to_ptr.vmem [resolvable:$false] %s571_s30 }
  0x24   : > { %s573_s4 = scalar_lea.vmem %s572_s30, 2048  ;;  %p574_p9 = scmp.lt.s32.totalorder %s763_s8, %s572_s30 }
  0x25   : > { %p569_p5 = pnand %p567_p2, %p553_p3  ;;  %p575_p4 = scmp.lt.s32.totalorder %s573_s4, %s566_s28 }
  0x27   : > { %p570_p11 = pneg %p569_p5  ;;  %p576_p7 = por %p575_p4, %p574_p9 }
  0x29   : > { %p577_p10 = pnand %p576_p7, %p570_p11 }
  0x2b   : > { %580 = shalt.err (!%p577_p10)
}
  0x2c   : > { %s666_s5 = smov 256   ;;  %s667_s7 = smov 16  }
  0x2d   : > { %485 = dma.hbm_to_vmem [thread:$0]  (!%p767_p0), %s761_s6, 1024, %s763_s8, %s772_s10, %s666_s5, %s666_s5, %s667_s7  }
  0x2e   : > { %p174_p12 = scmp.lt.s32.totalorder %s663_s17, 3  ;;  %p915_p1 = scmp.ge.s32.totalorder %s663_s17, 1 }
  0x30   : > { %p175_p3 = pnand %p915_p1, %p174_p12 }
  0x31   : > { %s804_s11 = sand.u32 (!%p175_p3), 1, %s647_s13  }
  0x32   : > { %178 = sbr.rel (%p175_p3) target bundleno = 218 (0xda), region = 32  ;;  %s469_s18 = sshll.u32 (!%p175_p3), %s804_s11, 6 }
  0x33   : > { %s181_s19 = scalar_lea.sflag (!%p175_p3), [#allocation3], %s804_s11  ;;  %s810_s21 = scalar_lea.vmem (!%p175_p3), [#allocation2], %s469_s18 }
  0x39   : > { %634 = dma.done.wait (%p739_p8), %s181_s19, 1024  }
  0x3a   : > { %636 = vsyncadd (%p739_p8), %s181_s19, 4294966272  ;;  %v668_v0 = vmov 0   ;;  %v280_v1 = vld [vmem:[%s906_s1 + $0x10] sm:$0xff]  ;;  %v278_v2 = vld [vmem:[%s906_s1] sm:$0xff]  ;;  %s477_s10 = sshll.u32 %s655_s15, 10  ;;  %s359_s23 = scalar_lea.sflag [#allocation4], %s804_s11 }
  0x3b   : > { %546 = vset.pattern.permute.xlu1 %v668_v0  ;;  %545 = vset.pattern.permute.xlu0 %v668_v0  ;;  %v281_v3 = vld [vmem:[%s906_s1 + $0x18] sm:$0xff]  ;;  %v279_v4 = vld [vmem:[%s906_s1 + $0x8] sm:$0xff]  ;;  %v282_v6 = vld [vmem:[%s907_s2] sm:$0xff]  ;;  %s856_s15 = scalar_lea.hbm %s908_s3, %s477_s10  ;;  %p916_p9 = scmp.ne.s32.totalorder %s912_s25, 0 }
  0x3c   : > { %306 = vperm.xlu1 %546, %v280_v1   ;;  %296 = vperm.xlu0 %545, %v278_v2   ;;  %v283_v5 = vld [vmem:[%s907_s2 + $0x8] sm:$0xff]  ;;  %v285_v7 = vld [vmem:[%s907_s2 + $0x18] sm:$0xff]  ;;  %v284_v8 = vld [vmem:[%s907_s2 + $0x10] sm:$0xff]  ;;  %s669_s28 = smov [#allocation5]  }
  0x3d   : > { %v209_v9 = vld [vmem:[%s810_s21] sm:$0xff]  ;;  %v211_v10 = vld [vmem:[%s810_s21 + $0x10] sm:$0xff]  ;;  %v210_v11 = vld [vmem:[%s810_s21 + $0x8] sm:$0xff]  ;;  %s585_s29 = sshll.u32 %s669_s28, 4  ;;  %s586_s29 = int_to_ptr.vmem [resolvable:$false] %s585_s29 }
  0x3e   : > { %v212_v12 = vld [vmem:[%s810_s21 + $0x18] sm:$0xff]  ;;  %v217_v13 = vadd.f32 %v211_v10, %v209_v9  ;;  %v213_v14 = vld [vmem:[%s810_s21 + $0x20] sm:$0xff]  ;;  %v214_v16 = vld [vmem:[%s810_s21 + $0x28] sm:$0xff]  ;;  %s587_s30 = scalar_lea.vmem %s586_s29, 2048 }
  0x3f   : > { %v226_v15 = vadd.f32 %v212_v12, %v210_v11  ;;  %v215_v18 = vld [vmem:[%s810_s21 + $0x30] sm:$0xff]  ;;  %v216_v20 = vld [vmem:[%s810_s21 + $0x38] sm:$0xff]  ;;  %s206_s21 = scalar_lea.vmem [#allocation5], %s469_s18 }
  0x40   : > { %311 = vperm.xlu1 %546, %v281_v3   ;;  %301 = vperm.xlu0 %545, %v279_v4   ;;  %v218_v17 = vadd.f32 %v217_v13, %v213_v14  ;;  %s374_s9 = sshll.u32 %s206_s21, 4  ;;  %s851_s9 = int_to_ptr.vmem [resolvable:$true] %s374_s9 }
  0x41   : > { %v227_v19 = vadd.f32 %v226_v15, %v214_v16  ;;  %s581_s24 = scalar_lea.vmem %s851_s9, 1024  ;;  %p588_p6 = scmp.lt.s32.totalorder %s851_s9, %s586_s29 }
  0x42   : > { %v219_v21 = vadd.f32 %v218_v17, %v215_v18  ;;  %p582_p8 = scmp.ne.s32.totalorder %s851_s9, %s581_s24  ;;  %p589_p13 = scmp.lt.s32.totalorder %s587_s30, %s581_s24 }
  0x43   : > { %v228_v22 = vadd.f32 %v227_v19, %v216_v20 }
  0x44   : > { %329 = vperm.xlu1 %546, %v283_v5   ;;  %324 = vperm.xlu0 %545, %v282_v6   ;;  %v220_v23 = vrot.slane %v219_v21, 4  ;;  %p583_p11 = pnand %p582_p8, %p916_p9  ;;  %p590_p2 = por %p589_p13, %p588_p6 }
  0x45   : > { %v229_v24 = vrot.slane %v228_v22, 4 }
  0x46   : > { %v221_v25 = vadd.f32 %v220_v23, %v219_v21  ;;  %p584_p0 = pneg %p583_p11 }
  0x47   : > { %v230_v26 = vadd.f32 %v229_v24, %v228_v22 }
  0x48   : > { %339 = vperm.xlu1 %546, %v285_v7   ;;  %334 = vperm.xlu0 %545, %v284_v8   ;;  %v222_v27 = vrot.slane %v221_v25, 2  ;;  %p591_p5 = pnand %p590_p2, %p584_p0 }
  0x49   : > { %v231_v28 = vrot.slane %v230_v26, 2 }
  0x4a   : > { %v223_v29 = vadd.f32 %v222_v27, %v221_v25 }
  0x4b   : > { %v232_v30 = vadd.f32 %v231_v28, %v230_v26 }
  0x4c   : > { %v224_v31 = vrot.slane %v223_v29, 1 }
  0x4d   : > { %v233_v32 = vrot.slane %v232_v30, 1 }
  0x4e   : > { %v225_v33 = vadd.f32 %v224_v31, %v223_v29 }
  0x4f   : > { %v234_v34 = vadd.f32 %v233_v32, %v232_v30 }
  0x50   : > { %v236_v35 = vmul.f32 0.03125, %v225_v33 }
  0x51   : > { %v237_v36 = vmul.f32 0.03125, %v234_v34 }
  0x52   : > { %v238_v37 = vsub.f32 %v209_v9, %v236_v35  ;;  %v240_v38 = vsub.f32 %v211_v10, %v236_v35  ;;  %v242_v41 = vsub.f32 %v213_v14, %v236_v35  ;;  %v244_v47 = vsub.f32 %v215_v18, %v236_v35 }
  0x53   : > { %v239_v39 = vsub.f32 %v210_v11, %v237_v36  ;;  %v241_v40 = vsub.f32 %v212_v12, %v237_v36  ;;  %v243_v44 = vsub.f32 %v214_v16, %v237_v36  ;;  %v245_v50 = vsub.f32 %v216_v20, %v237_v36 }
  0x54   : > { %v246_v42 = vmul.f32 %v238_v37, %v238_v37  ;;  %v248_v43 = vmul.f32 %v240_v38, %v240_v38  ;;  %v250_v48 = vmul.f32 %v242_v41, %v242_v41  ;;  %v252_v53 = vmul.f32 %v244_v47, %v244_v47 }
  0x55   : > { %v247_v45 = vmul.f32 %v239_v39, %v239_v39  ;;  %v249_v46 = vmul.f32 %v241_v40, %v241_v40  ;;  %v251_v51 = vmul.f32 %v243_v44, %v243_v44  ;;  %v253_v55 = vmul.f32 %v245_v50, %v245_v50 }
  0x56   : > { %v254_v49 = vadd.f32 %v248_v43, %v246_v42 }
  0x57   : > { %v263_v52 = vadd.f32 %v249_v46, %v247_v45 }
  0x58   : > { %v255_v54 = vadd.f32 %v254_v49, %v250_v48 }
  0x59   : > { %v264_v56 = vadd.f32 %v263_v52, %v251_v51 }
  0x5a   : > { %v256_v57 = vadd.f32 %v255_v54, %v252_v53 }
  0x5b   : > { %v265_v58 = vadd.f32 %v264_v56, %v253_v55 }
  0x5c   : > { %v257_v59 = vrot.slane %v256_v57, 4 }
  0x5d   : > { %v266_v60 = vrot.slane %v265_v58, 4 }
  0x5e   : > { %v258_v61 = vadd.f32 %v257_v59, %v256_v57 }
  0x5f   : > { %v267_v62 = vadd.f32 %v266_v60, %v265_v58 }
  0x60   : > { %v259_v63 = vrot.slane %v258_v61, 2 }
  0x61   : > { %v268_v0 = vrot.slane %v267_v62, 2 }
  0x62   : > { %v260_v1 = vadd.f32 %v259_v63, %v258_v61 }
  0x63   : > { %v269_v2 = vadd.f32 %v268_v0, %v267_v62 }
  0x64   : > { %v261_v3 = vrot.slane %v260_v1, 1 }
  0x65   : > { %v270_v4 = vrot.slane %v269_v2, 1 }
  0x66   : > { %v262_v5 = vadd.f32 %v261_v3, %v260_v1 }
  0x67   : > { %v271_v6 = vadd.f32 %v270_v4, %v269_v2 }
  0x68   : > { %v272_v7 = vmul.f32 0.03125, %v262_v5 }
  0x69   : > { %v273_v8 = vmul.f32 0.03125, %v271_v6 }
  0x6a   : > { %v274_v9 = vadd.f32 1e-05, %v272_v7 }
  0x6b   : > { %v275_v10 = vadd.f32 1e-05, %v273_v8 }
  0x6c   : > { %547 = vrsqrt.f32 %v274_v9 }
  0x6d   : > { %549 = vrsqrt.f32 %v275_v10 }
  0x76   : > { %v548_v11 = vpop.eup %547 }
  0x77   : > { %v550_v12 = vpop.eup %549  ;;  %v286_v15 = vmul.f32 %v548_v11, %v238_v37  ;;  %v288_v17 = vmul.f32 %v548_v11, %v240_v38  ;;  %v290_v21 = vmul.f32 %v548_v11, %v242_v41  ;;  %v292_v23 = vmul.f32 %v548_v11, %v244_v47 }
  0x78   : > { %v287_v16 = vmul.f32 %v550_v12, %v239_v39  ;;  %v289_v18 = vmul.f32 %v550_v12, %v241_v40  ;;  %v291_v22 = vmul.f32 %v550_v12, %v243_v44  ;;  %v293_v24 = vmul.f32 %v550_v12, %v245_v50 }
  0xbb   : > { %v307_v13 = vpop.permute.xlu1 %306  ;;  %v297_v14 = vpop.permute.xlu0 %296 }
  0xbc   : > { %v314_v25 = vmul.f32 %v297_v14, %v286_v15  ;;  %v315_v26 = vmul.f32 %v297_v14, %v287_v16  ;;  %v318_v35 = vmul.f32 %v307_v13, %v290_v21  ;;  %v319_v36 = vmul.f32 %v307_v13, %v291_v22 }
  0xbf   : > { %v312_v19 = vpop.permute.xlu1 %311  ;;  %v302_v20 = vpop.permute.xlu0 %301 }
  0xc0   : > { %v316_v27 = vmul.f32 %v302_v20, %v288_v17  ;;  %v317_v28 = vmul.f32 %v302_v20, %v289_v18  ;;  %v320_v37 = vmul.f32 %v312_v19, %v292_v23  ;;  %v321_v38 = vmul.f32 %v312_v19, %v293_v24 }
  0xc3   : > { %v330_v29 = vpop.permute.xlu1 %329  ;;  %v325_v30 = vpop.permute.xlu0 %324 }
  0xc4   : > { %v344_v31 = vadd.f32 %v330_v29, %v316_v27  ;;  %v345_v32 = vadd.f32 %v330_v29, %v317_v28  ;;  %v342_v33 = vadd.f32 %v325_v30, %v314_v25  ;;  %v343_v34 = vadd.f32 %v325_v30, %v315_v26 }
  0xc6   : > { %352 = vst [vmem:[%s206_s21 + $0x10] sm:$0xff] %v344_v31  ;;  %353 = vst [vmem:[%s206_s21 + $0x18] sm:$0xff] %v345_v32 }
  0xc7   : > { %350 = vst [vmem:[%s206_s21] sm:$0xff] %v342_v33  ;;  %351 = vst [vmem:[%s206_s21 + $0x8] sm:$0xff] %v343_v34  ;;  %v340_v39 = vpop.permute.xlu1 %339  ;;  %v335_v40 = vpop.permute.xlu0 %334 }
  0xc8   : > { %v348_v41 = vadd.f32 %v340_v39, %v320_v37  ;;  %v349_v42 = vadd.f32 %v340_v39, %v321_v38  ;;  %v346_v43 = vadd.f32 %v335_v40, %v318_v35  ;;  %v347_v44 = vadd.f32 %v335_v40, %v319_v36 }
  0xca   : > { %356 = vst [vmem:[%s206_s21 + $0x30] sm:$0xff] %v348_v41  ;;  %357 = vst [vmem:[%s206_s21 + $0x38] sm:$0xff] %v349_v42 }
  0xcb   : > { %354 = vst [vmem:[%s206_s21 + $0x20] sm:$0xff] %v346_v43  ;;  %355 = vst [vmem:[%s206_s21 + $0x28] sm:$0xff] %v347_v44 }
  0xcc   : > { %594 = shalt.err (!%p591_p5)
}
  0xcd   : > { %s595_s4 = scalar_lea.hbm %s856_s15, 1024  ;;  %s599_s19 = scalar_lea.hbm %s908_s3, 2048 }
  0xce   : > { %p596_p4 = scmp.ne.s32.totalorder %s856_s15, %s595_s4  ;;  %p600_p12 = scmp.lt.u32.totalorder %s856_s15, %s908_s3 }
  0xcf   : > { %p601_p1 = scmp.lt.u32.totalorder %s599_s19, %s595_s4  ;;  %p603_p8 = scmp.lt.u32.totalorder %s595_s4, %s856_s15 }
  0xd0   : > { %p597_p7 = pnand %p596_p4, %p916_p9 }
  0xd1   : > { %p602_p3 = por %p601_p1, %p600_p12 }
  0xd2   : > { %p598_p10 = pneg %p597_p7 }
  0xd3   : > { %p604_p11 = por %p603_p8, %p602_p3 }
  0xd5   : > { %p605_p0 = pnand %p604_p11, %p598_p10 }
  0xd7   : > { %608 = shalt.err (!%p605_p0)
}
  0xd8   : > { %s670_s21 = smov 256   ;;  %s671_s10 = smov 16  }
  0xd9   : > { %480 = dma.vmem_to_hbm [thread:$0]  (%p916_p9), %s851_s9, 1024, %s856_s15, %s359_s23, %s670_s21, %s670_s21, %s671_s10  }
  0xda PF: > { %s389_s18 = sand.u32 1, %s643_s12   ;;  %p917_p6 = scmp.ne.s32.totalorder %s913_s27, 0 }
  0xdb   : > { %p918_p13 = scmp.ge.s32.totalorder %s663_s17, 2  ;;  %s390_s22 = scalar_lea.sflag [#allocation4], %s389_s18 }
  0xdd   : > { %p487_p2 = pnand %p918_p13, %p917_p6 }
  0xdf   : > { %638 = dma.done.wait (!%p487_p2), %s390_s22, 1024  }
  0xe0   : > { %640 = vsyncadd (!%p487_p2), %s390_s22, 4294966272  ;;  %s19_s17 = sadd.s32 1, %s663_s17   ;;  %s919_s12 = smov %s647_s13 }
  0xe1   : > { %p16_p5 = scmp.ge.s32.totalorder %s19_s17, 4   ;;  %s920_s13 = smov %s651_s14 }
  0xe2   : > { %s921_s14 = smov %s748_s26  ;;  %s922_s15 = smov %s659_s16 }
  0xe3   : > { %s923_s16 = smov %s925_s20  ;;  %18 = sbr.rel (!%p16_p5) target bundleno = 6 (0x6), region = 77 }
  0xea   :  { %395 = vsyncpa [#allocation3], 1 }
  0xeb   :  { %397 = vsyncpa [#allocation3 + $0x1], 1 }
  0xec   :  { %398 = vsyncpa [#allocation4], 1 }
  0xed   :  { %400 = vsyncpa [#allocation4 + $0x1], 1 }

</bundles_post_ra>
